<compile_context>
chip_gen: v6e
topology: v6e:2x2x1
jax: 0.10.0
libtpu: 0.0.40
codegen_flags: <defaults>
</compile_context>

<pallas_src>
import functools

import jax
import jax.numpy as jnp
from jax.experimental import pallas as pl
from jax.experimental.pallas import tpu as pltpu


def _round_up(n: int, m: int) -> int:
    return ((n + m - 1) // m) * m


def _vmem_budgets():
    """(working-set budget, scoped vmem limit), generation aware (review #5/#6)."""
    try:
        cap = pltpu.get_tpu_info().vmem_capacity_bytes
    except Exception:
        cap = 64 * 1024 * 1024  # conservative (v7x-sized) fallback
    if cap >= 96 * 1024 * 1024:          # v5e / v6e: 128 MiB physical VMEM
        return 40 * 1024 * 1024, 64 * 1024 * 1024
    return 22 * 1024 * 1024, 32 * 1024 * 1024   # v7x: 64 MiB physical


# ----------------------------------------------------------------------------- kernels
def _head_wide_kernel(x_ref, w_ref, b_ref, o_ref, *, precision):
    # x_ref: (tr, 128*H)   w_ref: (128*H, 128) block-diagonal   b_ref: (1,) SMEM
    # o_ref: (tr, 128) lane-dense.
    z = jnp.dot(x_ref[...], w_ref[...],
                preferred_element_type=jnp.float32, precision=precision)
    z = z + b_ref[0]                                   # SMEM scalar broadcast
    # sigmoid: exp -> EUP, reciprocal -> EUP (approx); VALU stays nearly idle.
    p = pl.reciprocal(1.0 + jnp.exp(-z), approx=True)
    o_ref[...] = p.astype(o_ref.dtype)


def _head_rowsum_kernel(x_ref, w_ref, b_ref, o_ref):
    # x_ref: (tr, H)   w_ref: (1, H) lane-dense   b_ref: (1,) SMEM   o_ref: (tr, 1)
    prod = x_ref[...].astype(jnp.float32) * w_ref[...].astype(jnp.float32)
    z = jnp.sum(prod, axis=1, keepdims=True) + b_ref[0]   # exact f32 reduction (VPU+XLU)
    p = pl.reciprocal(1.0 + jnp.exp(-z), approx=True)
    o_ref[...] = p.astype(o_ref.dtype)


# ----------------------------------------------------------------------------- wrapper
@functools.partial(jax.jit, static_argnames=("precision",))
def decision_head(x, weight, bias, *, precision=None):
    """x: (B, T, H); weight: (1, H) (PyTorch Linear layout); bias: (1,). Returns (B, T).

    `precision=jax.lax.Precision.HIGHEST` gives strict f32 parity with a PyTorch fp32
    reference on the wide (MXU) path; the default single-pass matmul keeps the kernel
    HBM-bound on all generations (the fallback path is always exact f32).
    """
    B, T, H = x.shape
    rows = B * T
    itemsize = jnp.dtype(x.dtype).itemsize
    sub = 8 * (4 // max(itemsize, 1))          # sublane multiple: 8 f32 / 16 bf16 / 32 i8
    budget, vmem_limit = _vmem_budgets()

    x2d = x.reshape(rows, H)
    b1 = bias.reshape((1,)).astype(jnp.float32)

    compiler_params = pltpu.CompilerParams(
        # Rows are independent -> "parallel" lets Mosaic shard grid steps across both
        # v7x TensorCores (pltpu.CORE_PARALLEL is the more aggressive alternative).
        dimension_semantics=("parallel",),
        vmem_limit_bytes=vmem_limit,
    )

    # Expanded weight for the lane-dense path: W_big[(l, h), m] = delta(l, m) * w[h].
    wide_w_bytes = 128 * H * 128 * itemsize
    use_wide = (rows % 128 == 0) and (rows >= 128) and (2 * wide_w_bytes <= budget // 2)

    if use_wide:
        R, Hw = rows // 128, 128 * H
        x_wide = x2d.reshape(R, Hw)                               # free reshape
        w_big = jnp.kron(jnp.eye(128, dtype=weight.dtype),
                         weight.reshape(H, 1)).astype(x.dtype)    # (128*H, 128)

        # Tile sizing: double-buffered input (tr, Hw) + output (tr, 128) tiles,
        # weight counted twice (conservative); all dims already lane/sublane aligned.
        per_unit = 2 * Hw * itemsize + 2 * 128 * itemsize
        avail = max(budget - 2 * wide_w_bytes, per_unit * sub)
        tr = max(sub, (avail // per_unit) // sub * sub)
        min_tr = max(sub, _round_up((2 << 20) // (Hw * itemsize), sub))  # >= ~2 MiB tile
        tr = min(tr, max(min_tr, _round_up(pl.cdiv(R, 8), sub)))          # >= ~8 steps
        if tr >= R:
            tr = R                       # full-extent block is always legal

        out = pl.pallas_call(
            functools.partial(_head_wide_kernel, precision=precision),
            out_shape=jax.ShapeDtypeStruct((R, 128), x.dtype),
            grid=(pl.cdiv(R, tr),),
            in_specs=[
                pl.BlockSpec((tr, Hw), lambda i: (i, 0)),     # streamed activations
                pl.BlockSpec((Hw, 128), lambda i: (0, 0)),    # weight: resident in VMEM
                pl.BlockSpec(memory_space=pltpu.MemorySpace.SMEM),  # bias scalar
            ],
            out_specs=pl.BlockSpec((tr, 128), lambda i: (i, 0)),
            compiler_params=compiler_params,
        )(x_wide, w_big, b1)
        return out.reshape(B, T)

    # -------- fallback: ragged row count and/or large H ------------------------------
    Hp = _round_up(H, 128)                                   # lane-padded VMEM width
    bytes_per_row = (Hp + 128) * itemsize                    # input row + padded out row
    tr = max(sub, (budget // (2 * bytes_per_row)) // sub * sub)
    min_tr = max(sub, _round_up((2 << 20) // (Hp * itemsize), sub))
    tr = min(tr, max(min_tr, _round_up(pl.cdiv(rows, 8), sub)))
    if tr >= rows:
        tr = rows

    out = pl.pallas_call(
        _head_rowsum_kernel,
        out_shape=jax.ShapeDtypeStruct((rows, 1), x.dtype),
        grid=(pl.cdiv(rows, tr),),       # ragged tail: padded reads, masked OOB writes
        in_specs=[
            pl.BlockSpec((tr, H), lambda i: (i, 0)),
            pl.BlockSpec((1, H), lambda i: (0, 0)),          # weight kept lane-dense
            pl.BlockSpec(memory_space=pltpu.MemorySpace.SMEM),
        ],
        out_specs=pl.BlockSpec((tr, 1), lambda i: (i, 0)),
        compiler_params=compiler_params,
    )(x2d, weight.reshape(1, H), b1)
    return out[:, 0].reshape(B, T)


def _reference(x, weight, bias):
    logits = jnp.einsum("bth,oh->bto", x, weight) + bias
    return jax.nn.sigmoid(logits)[..., 0]          # squeeze(2)


if __name__ == "__main__":
    key = jax.random.PRNGKey(0)
    k_x, k_w, k_b, k_x2 = jax.random.split(key, 4)

    B, T, H = 2, 8, 32  # batch, seq, hidden_dims

    # nn.Linear default init U(-1/sqrt(H), 1/sqrt(H)); bias re-init N(mean=-20, std=0.1)
    # per the PyTorch module's torch.nn.init.normal_ call.
    bound = 1.0 / (H ** 0.5)
    weight = jax.random.uniform(k_w, (1, H), jnp.float32, -bound, bound)
    bias = -20.0 + 0.1 * jax.random.normal(k_b, (1,), jnp.float32)

    # Case 1: small / non-128-aligned row count (16 rows) -> exact row-sum fallback path.
    x1 = jax.random.normal(k_x, (B, T, H), jnp.float32)
    out1 = jax.block_until_ready(decision_head(x1, weight, bias))
    assert out1.shape == (B, T)
    assert jnp.allclose(out1, _reference(x1, weight, bias), atol=2e-6, rtol=2e-3)

    # Case 2: 128-aligned row count (4*64=256 rows) -> lane-dense wide MXU path.
    # Tolerance accounts for default MXU matmul precision (see review note).
    x2 = jax.random.normal(k_x2, (4, 64, H), jnp.float32)
    out2 = jax.block_until_ready(decision_head(x2, weight, bias))
    assert out2.shape == (4, 64)
    assert jnp.allclose(out2, _reference(x2, weight, bias), atol=2e-6, rtol=2e-3)

    print("KERNEL_OK")
</pallas_src>

<mosaic_0001>
module attributes {stable_mosaic.version = 11 : i64} {
  func.func @_head_rowsum_kernel(%arg0: i32, %arg1: memref<16x32xf32, #tpu.memory_space<vmem>>, %arg2: memref<1x32xf32, #tpu.memory_space<vmem>>, %arg3: memref<1xf32, #tpu.memory_space<smem>>, %arg4: memref<16x1xf32, #tpu.memory_space<vmem>>) attributes {dimension_semantics = [#tpu.dimension_semantics<parallel>], iteration_bounds = array<i64: 1>, scalar_prefetch = 0 : i64, scratch_operands = 0 : i64, tpu.core_type = #tpu.core_type<tc>, window_params = [{transform_indices = @transform_0, window_bounds = array<i64: 16, 32>}, {pipeline_mode = #tpu.pipeline_mode<synchronous>, transform_indices = @transform_1, window_bounds = array<i64: 1, 32>}, {transform_indices = @transform_2, window_bounds = array<i64: 1>}, {transform_indices = @transform_3, window_bounds = array<i64: 16, 1>}]} {
    %c0 = arith.constant 0 : index
    %c0_0 = arith.constant 0 : index
    %0 = vector.load %arg1[%c0, %c0_0] : memref<16x32xf32, #tpu.memory_space<vmem>>, vector<16x32xf32>
    %c0_1 = arith.constant 0 : index
    %c0_2 = arith.constant 0 : index
    %1 = vector.load %arg2[%c0_1, %c0_2] : memref<1x32xf32, #tpu.memory_space<vmem>>, vector<1x32xf32>
    %2 = vector.broadcast %1 : vector<1x32xf32> to vector<16x32xf32>
    %3 = arith.mulf %0, %2 : vector<16x32xf32>
    %cst = arith.constant dense<0.000000e+00> : vector<16xf32>
    %4 = vector.multi_reduction <add>, %3, %cst [1] : vector<16x32xf32> to vector<16xf32>
    %5 = vector.shape_cast %4 : vector<16xf32> to vector<16x1xf32>
    %c0_3 = arith.constant 0 : index
    %6 = memref.load %arg3[%c0_3] : memref<1xf32, #tpu.memory_space<smem>>
    %7 = vector.broadcast %6 : f32 to vector<16x1xf32>
    %8 = arith.addf %5, %7 : vector<16x1xf32>
    %cst_4 = arith.constant 0.000000e+00 : f32
    %9 = vector.broadcast %cst_4 : f32 to vector<16x1xf32>
    %10 = arith.subf %9, %8 : vector<16x1xf32>
    %11 = math.exp %10 : vector<16x1xf32>
    %cst_5 = arith.constant 1.000000e+00 : f32
    %12 = vector.broadcast %cst_5 : f32 to vector<16x1xf32>
    %13 = arith.addf %12, %11 : vector<16x1xf32>
    %14 = tpu.reciprocal %13 {approx = true} : vector<16x1xf32> -> vector<16x1xf32>
    %c0_6 = arith.constant 0 : index
    %c0_7 = arith.constant 0 : index
    %15 = vector.load %arg4[%c0_6, %c0_7] : memref<16x1xf32, #tpu.memory_space<vmem>>, vector<16x1xf32>
    tpu.vector_store %arg4[%c0_6, %c0_7], %14 {strides = array<i32>} : memref<16x1xf32, #tpu.memory_space<vmem>>, vector<16x1xf32>,
    return
  }
  func.func @transform_0(%arg0: i32) -> (i32, i32) {
    %c0_i32 = arith.constant 0 : i32
    %c0_i32_0 = arith.constant 0 : i32
    return %arg0, %c0_i32 : i32, i32
  }
  func.func @transform_1(%arg0: i32) -> (i32, i32) {
    %c0_i32 = arith.constant 0 : i32
    %c0_i32_0 = arith.constant 0 : i32
    %c0_i32_1 = arith.constant 0 : i32
    return %c0_i32, %c0_i32_0 : i32, i32
  }
  func.func @transform_2(%arg0: i32) -> i32 {
    %c0_i32 = arith.constant 0 : i32
    %c0_i32_0 = arith.constant 0 : i32
    return %c0_i32 : i32
  }
  func.func @transform_3(%arg0: i32) -> (i32, i32) {
    %c0_i32 = arith.constant 0 : i32
    %c0_i32_0 = arith.constant 0 : i32
    return %arg0, %c0_i32 : i32, i32
  }
}

</mosaic_0001>

<bundles_post_ra>
// kernel: squeeze.1
= control target key start
LH: loop header
LB: loop body
LE: loop exit
PB: predicated region body
PF: predicated region fallthrough
CT: control target
= control target key end

     0   :  { %s77_s0 = inlined_call_operand.vmem [shape: f32[16], index: 0, kind: input, shape index: {}]   ;;  %s78_s1 = inlined_call_operand.hbm [shape: f32[2,8], index: 1, kind: output, shape index: {}]  }
   0x1   :  { %v6_v0 = vld [vmem:[%s77_s0] sm:$0x1] }
   0x2   :  { %2 = vsyncpa [#allocation1], 0  ;;  %7 = vst [vmem:[#allocation3] sm:$0x1] %v6_v0  ;;  %vm9_vm0 = vcmask 64512   ;;  %s59_s0 = smov 120  }
   0x3   :  { %s60_s8 = smov [#allocation0]  }
   0x4   :  { %s29_s9 = sshll.u32 %s60_s8, 4  ;;  %s30_s9 = int_to_ptr.vmem [resolvable:$true] %s29_s9 }
   0x5   :  { %s37_s10 = scalar_lea.vmem %s30_s9, 32  ;;  %p42_p1 = scmp.lt.s32.totalorder %s30_s9, %s30_s9 }
   0x6   :  { %p38_p0 = scmp.ne.s32.totalorder %s30_s9, %s37_s10  ;;  %p43_p2 = scmp.lt.s32.totalorder %s37_s10, %s37_s10 }
   0x8   :  { %p44_p3 = por %p43_p2, %p42_p1 }
   0x9   :  { %v11_v1 = vld [vmem:[#allocation3] sm:$0x1]  }
   0xa   :  { %v8_v2 = vld [vmem:[#allocation3] sm:$0x1]   ;;  %12 = vrot.lane.b32.xlu0 %v11_v1, %s59_s0  ;;  %p45_p4 = pnand %p44_p3, %p38_p0 }
   0xb   :  { %10 = vst.msk [vmem:[#allocation2] sm:$0x1] %vm9_vm0, %v8_v2  }
  0x7c   :  { %v13_v3 = vpop.permute.xlu0 %12  }
  0x7d   :  { %16 = vst.msk [vmem:[#allocation2 + $0x1] sm:$0x1] %vm9_vm0, %v13_v3  }
  0x84   :  { %v21_v4 = vld [vmem:[#allocation2] sm:$0x3] }
  0x85   :  { %24 = vst [vmem:[#allocation0] sm:$0x3] %v21_v4 }
  0x86   :  { %48 = shalt.err (!%p45_p4)
}
  0x87   :  { %32 = dma.vmem_to_hbm [thread:$0]  %s30_s9, 32, %s78_s1, [#allocation1]  }
  0x88   :  { %57 = dma.done.wait [#allocation1], 32  }
  0x89   :  { %58 = vsyncadd [#allocation1], 4294967264 }
  0x8a   :  { %34 = vsyncpa [#allocation1], 1 }

// kernel: decision_head.1
= control target key start
LH: loop header
LB: loop body
LE: loop exit
PB: predicated region body
PF: predicated region fallthrough
CT: control target
= control target key end

     0   :  { %9 = vsyncpa [#allocation4], 0  ;;  %s103_s12 = smov [#allocation3]   ;;  %s141_s0 = inlined_call_operand.hbm [shape: f32[16,32], index: 0, kind: input, shape index: {}]   ;;  %s142_s1 = inlined_call_operand.vmem [shape: f32[1,32], index: 1, kind: input, shape index: {}]   ;;  %s143_s2 = inlined_call_operand.<no memory space> [shape: f32[1], index: 2, kind: input, shape index: {}]   ;;  %s144_s3 = inlined_call_operand.vmem [shape: f32[16,1], index: 3, kind: output, shape index: {}]  }
   0x1   :  { %s15_s13 = sshll.u32 %s103_s12, 4  ;;  %s16_s13 = int_to_ptr.vmem [resolvable:$true] %s15_s13 }
   0x2   :  { %s89_s14 = scalar_lea.vmem %s16_s13, 256  ;;  %p94_p1 = scmp.lt.s32.totalorder %s16_s13, %s16_s13 }
   0x3   :  { %p90_p0 = scmp.ne.s32.totalorder %s16_s13, %s89_s14  ;;  %p95_p2 = scmp.lt.s32.totalorder %s89_s14, %s89_s14 }
   0x5   :  { %p96_p3 = por %p95_p2, %p94_p1 }
   0x7   :  { %p97_p4 = pnand %p96_p3, %p90_p0 }
   0x9   :  { %100 = shalt.err (!%p97_p4)
}
   0xa   :  { %s104_s15 = smov 128   ;;  %s105_s16 = smov 8  }
   0xb   :  { %21 = dma.hbm_to_vmem [thread:$0]  %s141_s0, 256, %s16_s13, [#allocation4], %s104_s15, %s104_s15, %s105_s16  }
   0xc   :  { %101 = dma.done.wait [#allocation4], 256  }
   0xd   :  { %102 = vsyncadd [#allocation4], 4294967040  ;;  %v29_v0 = vld [vmem:[#allocation3] sm:$0xff]  ;;  %vm40_vm0 = vcmask 261120   ;;  %v30_v2 = vld [vmem:[#allocation3 + $0x8] sm:$0xff]  ;;  %v48_v7 = vstv %s143_s2  ;;  %vm61_vm1 = vcmask 7168  }
   0xe   :  { %v69_v1 = vld [vmem:[%s142_s1] ss:$0 sm:$0xff] }
   0xf   :  { %v38_v3 = vmul.f32 %v69_v1, %v29_v0  ;;  %v39_v4 = vmul.f32 %v69_v1, %v30_v2 }
  0x11   :  { %v41_v5 = vsel %vm40_vm0, %v38_v3, 0.0  ;;  %v44_v6 = vsel %vm40_vm0, %v39_v4, 0.0 }
  0x12   :  { %42 = vadd.xlane.f32.xlu0 %v41_v5 }
  0x16   :  { %45 = vadd.xlane.f32.xlu0 %v44_v6 }
  0x9b   :  { %v43_v8 = vpop.xlane.xlu0 %42 }
  0x9c   :  { %v49_v9 = vadd.f32 %v48_v7, %v43_v8 }
  0x9e   :  { %v51_v10 = vsub.f32 0.0, %v49_v9 }
  0x9f   :  { %v46_v11 = vpop.xlane.xlu0 %45 }
  0xa0   :  { %v53_v12 = vmul.f32 1.442695, %v51_v10  ;;  %v50_v13 = vadd.f32 %v48_v7, %v46_v11 }
  0xa2   :  { %73 = vpow2.f32 %v53_v12  ;;  %v52_v14 = vsub.f32 0.0, %v50_v13 }
  0xa4   :  { %v55_v15 = vmul.f32 1.442695, %v52_v14 }
  0xa6   :  { %75 = vpow2.f32 %v55_v15 }
  0xaf   :  { %v74_v16 = vpop.eup %73 }
  0xb0   :  { %v57_v17 = vadd.f32 1.0, %v74_v16 }
  0xb2   :  { %77 = vrcp.f32 %v57_v17 }
  0xb3   :  { %v76_v18 = vpop.eup %75 }
  0xb4   :  { %v58_v19 = vadd.f32 1.0, %v76_v18 }
  0xb6   :  { %79 = vrcp.f32 %v58_v19 }
  0xbf   :  { %v78_v20 = vpop.eup %77 }
  0xc0   :  { %62 = vst.msk [vmem:[%s144_s3] sm:$0xff] %vm61_vm1, %v78_v20 }
  0xc3   :  { %v80_v21 = vpop.eup %79 }
  0xc4   :  { %63 = vst.msk [vmem:[%s144_s3 + $0x8] sm:$0xff] %vm61_vm1, %v80_v21 }
  0xc5   :  { %68 = vsyncpa [#allocation4], 1 }

</bundles_post_ra>
